<compile_context>
chip_gen: v7x
topology: tpu7x:2x2x1
jax: 0.10.0
libtpu: 0.0.40
codegen_flags: <defaults>
</compile_context>

<pallas_src>
import functools

import jax
import jax.numpy as jnp
from jax.experimental import pallas as pl
from jax.experimental.pallas import tpu as pltpu

_LANE = 128
_TK_CANDIDATES = (2048, 1024, 512, 256, 128)   # contraction tile targets
_TN_CANDIDATES = (2048, 1024, 512, 256, 128)   # output tile targets
_VMEM_LIMIT = 40 << 20                         # safe on v5e/v6e/v7x


def _round_up(x, m):
    return (x + m - 1) // m * m


def _pick_tile(n, candidates):
    """Largest candidate that exactly divides n, else the full dimension."""
    for c in candidates:
        if n % c == 0:
            return c
    return n


# --------------------------------------------------------------------------
# Tiled Linear: y = x @ w + b   (w pre-transposed to (K_pad, N), bf16)
# --------------------------------------------------------------------------
def _linear_kernel(x_ref, w_ref, b_ref, o_ref, acc_ref):
    k = pl.program_id(1)

    @pl.when(k == 0)
    def _init():
        # Fold the bias into the accumulator init (no extra VPU pass later).
        acc_ref[...] = jnp.broadcast_to(b_ref[...], acc_ref.shape)

    acc_ref[...] += jnp.dot(x_ref[...], w_ref[...],
                            preferred_element_type=jnp.float32)

    @pl.when(k == pl.num_programs(1) - 1)
    def _store():
        o_ref[...] = acc_ref[...].astype(o_ref.dtype)


def _pallas_linear(x, w, b, *, out_dtype):
    """x: (B, K) bf16; w: (K_pad, N) bf16; b: (1, N) f32 -> (B, N) out_dtype."""
    B, K = x.shape
    K_pad, N = w.shape
    if K_pad > K:                               # zero-pad contraction dim
        x = jnp.pad(x, ((0, 0), (0, K_pad - K)))
    tk = _pick_tile(K_pad, _TK_CANDIDATES)
    tn = _pick_tile(N, _TN_CANDIDATES)
    grid = (N // tn, K_pad // tk)               # reduction axis innermost

    return pl.pallas_call(
        _linear_kernel,
        out_shape=jax.ShapeDtypeStruct((B, N), out_dtype),
        grid=grid,
        in_specs=[
            pl.BlockSpec((B, tk), lambda n, k: (0, k)),
            pl.BlockSpec((tk, tn), lambda n, k: (k, n)),
            pl.BlockSpec((1, tn), lambda n, k: (0, n)),
        ],
        out_specs=pl.BlockSpec((B, tn), lambda n, k: (0, n)),
        scratch_shapes=[pltpu.VMEM((B, tn), jnp.float32)],
        compiler_params=pltpu.CompilerParams(
            dimension_semantics=("parallel", "arbitrary"),
            vmem_limit_bytes=_VMEM_LIMIT,
        ),
    )(x, w, b)


# --------------------------------------------------------------------------
# Fused heads: h2 @ [wc | pad | wr] + b, then in-register class softmax.
# Head layout columns: [0, rc) = cls, [rc, rc_pad) = zero pad, [rc_pad, ...) = reg,
# so both output slices of the accumulator start at lane-aligned offsets.
# --------------------------------------------------------------------------
def _head_kernel(x_ref, w_ref, b_ref, cls_ref, reg_ref, acc_ref, *,
                 n_rois, n_classes, rc_pad):
    k = pl.program_id(0)

    @pl.when(k == 0)
    def _init():
        acc_ref[...] = jnp.broadcast_to(b_ref[...], acc_ref.shape)

    acc_ref[...] += jnp.dot(x_ref[...], w_ref[...],
                            preferred_element_type=jnp.float32)

    @pl.when(k == pl.num_programs(0) - 1)
    def _finalize():
        acc = acc_ref[...]
        B = acc.shape[0]
        rc = n_rois * n_classes
        logits = acc[:, :rc].reshape(B, n_rois, n_classes)
        m = jnp.max(logits, axis=-1, keepdims=True)        # stable softmax
        e = jnp.exp(logits - m)
        s = jnp.sum(e, axis=-1, keepdims=True)
        # Lane-dense (B, rc) store; wrapper reshapes to (B, n_rois, n_classes).
        cls_ref[...] = (e / s).reshape(B, rc).astype(cls_ref.dtype)
        reg_ref[...] = acc[:, rc_pad:].astype(reg_ref.dtype)


def _pallas_heads(h, w_heads, b_heads, *, n_rois, n_classes):
    B, K = h.shape
    K_pad, Nh = w_heads.shape
    if K_pad > K:
        h = jnp.pad(h, ((0, 0), (0, K_pad - K)))
    rc = n_rois * n_classes
    rc4 = rc * 4
    rc_pad = _round_up(rc, _LANE)
    assert Nh == rc_pad + rc4
    tk = _pick_tile(K_pad, _TK_CANDIDATES)
    grid = (K_pad // tk,)

    kernel = functools.partial(_head_kernel, n_rois=n_rois,
                               n_classes=n_classes, rc_pad=rc_pad)
    cls_flat, reg = pl.pallas_call(
        kernel,
        out_shape=(jax.ShapeDtypeStruct((B, rc), jnp.float32),
                   jax.ShapeDtypeStruct((B, rc4), jnp.float32)),
        grid=grid,
        in_specs=[
            pl.BlockSpec((B, tk), lambda k: (0, k)),
            pl.BlockSpec((tk, Nh), lambda k: (k, 0)),
            pl.BlockSpec((1, Nh), lambda k: (0, 0)),
        ],
        out_specs=(
            pl.BlockSpec((B, rc), lambda k: (0, 0)),
            pl.BlockSpec((B, rc4), lambda k: (0, 0)),
        ),
        scratch_shapes=[pltpu.VMEM((B, Nh), jnp.float32)],
        compiler_params=pltpu.CompilerParams(
            dimension_semantics=("arbitrary",),
            vmem_limit_bytes=_VMEM_LIMIT,
        ),
    )(h, w_heads, b_heads)
    return cls_flat, reg


# --------------------------------------------------------------------------
# One-time parameter preparation (do NOT redo per forward call)
# --------------------------------------------------------------------------
def prepare_params(params, n_rois, n_classes):
    """PyTorch-layout f32 params -> kernel layout: (in_pad, out) bf16 weights,
    (1, out) f32 biases, concatenated (cls|pad|reg) head weights."""
    rc = n_rois * n_classes
    rc_pad = _round_up(rc, _LANE)

    def prep_w(w):                      # (out, in) -> (in_pad, out) bf16
        wt = w.T.astype(jnp.bfloat16)
        k = wt.shape[0]
        k_pad = _round_up(k, _LANE)
        if k_pad > k:
            wt = jnp.pad(wt, ((0, k_pad - k), (0, 0)))
        return wt

    def prep_b(b):
        return b.astype(jnp.float32)[None, :]

    w1, b1 = prep_w(params["w1"]), prep_b(params["b1"])
    w2, b2 = prep_w(params["w2"]), prep_b(params["b2"])
    wc, bc = prep_w(params["wc"]), prep_b(params["bc"])
    wr, br = prep_w(params["wr"]), prep_b(params["br"])

    k_pad = wc.shape[0]
    w_heads = jnp.concatenate(
        [wc, jnp.zeros((k_pad, rc_pad - rc), jnp.bfloat16), wr], axis=1)
    b_heads = jnp.concatenate(
        [bc, jnp.zeros((1, rc_pad - rc), jnp.float32), br], axis=1)

    return dict(w1=w1, b1=b1, w2=w2, b2=b2, w_heads=w_heads, b_heads=b_heads)


def fastrcnn_forward(x, prepared, n_rois, n_classes):
    """x: (B, d_in) float.  Returns (cls (B,R,C) softmaxed, reg (B,R*C*4))."""
    x = x.astype(jnp.bfloat16)
    h1 = _pallas_linear(x, prepared["w1"], prepared["b1"], out_dtype=jnp.bfloat16)
    h2 = _pallas_linear(h1, prepared["w2"], prepared["b2"], out_dtype=jnp.bfloat16)
    cls_flat, reg = _pallas_heads(h2, prepared["w_heads"], prepared["b_heads"],
                                  n_rois=n_rois, n_classes=n_classes)
    cls = cls_flat.reshape(x.shape[0], n_rois, n_classes)
    return cls, reg


# --------------------------------------------------------------------------
# Pure-JAX reference (f32, PyTorch-layout params)
# --------------------------------------------------------------------------
def fastrcnn_forward_ref(x, params, n_rois, n_classes):
    h1 = x @ params["w1"].T + params["b1"]
    h2 = h1 @ params["w2"].T + params["b2"]
    cls = h2 @ params["wc"].T + params["bc"]
    reg = h2 @ params["wr"].T + params["br"]
    cls = cls.reshape(x.shape[0], n_rois, n_classes)
    cls = jax.nn.softmax(cls, axis=2)
    return cls, reg


def init_params(key, d_in, hidden, n_rois, n_classes):
    """Deterministic PyTorch-nn.Linear-style uniform init (f32, (out, in))."""
    ks = jax.random.split(key, 8)

    def lin(kw, kb, fan_in, fan_out):
        bound = 1.0 / jnp.sqrt(jnp.float32(fan_in))
        w = jax.random.uniform(kw, (fan_out, fan_in), jnp.float32, -bound, bound)
        b = jax.random.uniform(kb, (fan_out,), jnp.float32, -bound, bound)
        return w, b

    w1, b1 = lin(ks[0], ks[1], d_in, hidden)
    w2, b2 = lin(ks[2], ks[3], hidden, hidden)
    wc, bc = lin(ks[4], ks[5], hidden, n_rois * n_classes)
    wr, br = lin(ks[6], ks[7], hidden, n_rois * n_classes * 4)
    return dict(w1=w1, b1=b1, w2=w2, b2=b2, wc=wc, bc=bc, wr=wr, br=br)


if __name__ == "__main__":
    key = jax.random.PRNGKey(0)
    k_param, k_x = jax.random.split(key)

    B = 2
    n_rois = 4
    n_classes = 8
    # Module uses d_in = 512 * n_rois * 7 * 7 and hidden = 4096; scale channels
    # (512 -> 8) and hidden (4096 -> 384) for a small test while keeping the
    # same forward structure.  d_in = 1568 also exercises the K-padding path
    # and hidden = 384 exercises multi-tile N and multi-step K reduction.
    feat_channels = 8
    d_in = feat_channels * n_rois * 7 * 7   # 1568
    hidden = 384

    params = init_params(k_param, d_in, hidden, n_rois, n_classes)
    prepared = prepare_params(params, n_rois, n_classes)   # one-time prep
    x = jax.random.normal(k_x, (B, d_in), jnp.float32)

    fwd = jax.jit(functools.partial(fastrcnn_forward,
                                    n_rois=n_rois, n_classes=n_classes))
    cls_out, reg_out = jax.block_until_ready(fwd(x, prepared))

    cls_ref, reg_ref = fastrcnn_forward_ref(x, params, n_rois, n_classes)

    assert cls_out.shape == (B, n_rois, n_classes)
    assert reg_out.shape == (B, n_rois * n_classes * 4)
    # bf16 weights/activations => loosened tolerances vs the f32 reference.
    assert jnp.allclose(cls_out, cls_ref, atol=2e-2, rtol=2e-2), (
        float(jnp.max(jnp.abs(cls_out - cls_ref))))
    assert jnp.allclose(reg_out, reg_ref, atol=5e-2, rtol=5e-2), (
        float(jnp.max(jnp.abs(reg_out - reg_ref))))

    print("KERNEL_OK")
</pallas_src>

<mosaic_0001>
module attributes {stable_mosaic.version = 11 : i64} {
  func.func @_linear_kernel(%arg0: i32, %arg1: i32, %arg2: memref<2x128xbf16, #tpu.memory_space<vmem>>, %arg3: memref<128x128xbf16, #tpu.memory_space<vmem>>, %arg4: memref<1x128xf32, #tpu.memory_space<vmem>>, %arg5: memref<2x128xbf16, #tpu.memory_space<vmem>>, %arg6: memref<2x128xf32, #tpu.memory_space<vmem>>) attributes {dimension_semantics = [#tpu.dimension_semantics<parallel>, #tpu.dimension_semantics<arbitrary>], iteration_bounds = array<i64: 3, 13>, scalar_prefetch = 0 : i64, scratch_operands = 1 : i64, tpu.core_type = #tpu.core_type<tc>, window_params = [{transform_indices = @transform_0, window_bounds = array<i64: 2, 128>}, {transform_indices = @transform_1, window_bounds = array<i64: 128, 128>}, {transform_indices = @transform_2, window_bounds = array<i64: 1, 128>}, {transform_indices = @transform_3, window_bounds = array<i64: 2, 128>}]} {
    %c0_i32 = arith.constant 0 : i32
    %0 = arith.cmpi eq, %arg1, %c0_i32 : i32
    %1 = arith.extui %0 : i1 to i32
    %c0_i32_0 = arith.constant 0 : i32
    %2 = arith.cmpi ne, %1, %c0_i32_0 : i32
    scf.if %2 {
      %c0_9 = arith.constant 0 : index
      %c0_10 = arith.constant 0 : index
      %12 = vector.load %arg4[%c0_9, %c0_10] : memref<1x128xf32, #tpu.memory_space<vmem>>, vector<1x128xf32>
      %13 = vector.shape_cast %12 : vector<1x128xf32> to vector<1x128xf32>
      %14 = vector.broadcast %13 : vector<1x128xf32> to vector<2x128xf32>
      %c0_11 = arith.constant 0 : index
      %c0_12 = arith.constant 0 : index
      %15 = vector.load %arg6[%c0_11, %c0_12] : memref<2x128xf32, #tpu.memory_space<vmem>>, vector<2x128xf32>
      tpu.vector_store %arg6[%c0_11, %c0_12], %14 {strides = array<i32>} : memref<2x128xf32, #tpu.memory_space<vmem>>, vector<2x128xf32>,
    } else {
    }
    %c0 = arith.constant 0 : index
    %c0_1 = arith.constant 0 : index
    %3 = vector.load %arg6[%c0, %c0_1] : memref<2x128xf32, #tpu.memory_space<vmem>>, vector<2x128xf32>
    %c0_2 = arith.constant 0 : index
    %c0_3 = arith.constant 0 : index
    %4 = vector.load %arg2[%c0_2, %c0_3] : memref<2x128xbf16, #tpu.memory_space<vmem>>, vector<2x128xbf16>
    %c0_4 = arith.constant 0 : index
    %c0_5 = arith.constant 0 : index
    %5 = vector.load %arg3[%c0_4, %c0_5] : memref<128x128xbf16, #tpu.memory_space<vmem>>, vector<128x128xbf16>
    %cst = arith.constant dense<0.000000e+00> : vector<2x128xf32>
    %6 = tpu.matmul %4, %5, %cst {dimension_numbers = #tpu.dot_dimension_numbers<[1], [0], [0], [1], [0, 0, 1, 1], [], []>} : vector<2x128xbf16>, vector<128x128xbf16>, vector<2x128xf32> -> vector<2x128xf32>
    %7 = arith.addf %3, %6 : vector<2x128xf32>
    %c0_6 = arith.constant 0 : index
    %c0_7 = arith.constant 0 : index
    %8 = vector.load %arg6[%c0_6, %c0_7] : memref<2x128xf32, #tpu.memory_space<vmem>>, vector<2x128xf32>
    tpu.vector_store %arg6[%c0_6, %c0_7], %7 {strides = array<i32>} : memref<2x128xf32, #tpu.memory_space<vmem>>, vector<2x128xf32>,
    %c12_i32 = arith.constant 12 : i32
    %9 = arith.cmpi eq, %arg1, %c12_i32 : i32
    %10 = arith.extui %9 : i1 to i32
    %c0_i32_8 = arith.constant 0 : i32
    %11 = arith.cmpi ne, %10, %c0_i32_8 : i32
    scf.if %11 {
      %c0_9 = arith.constant 0 : index
      %c0_10 = arith.constant 0 : index
      %12 = vector.load %arg6[%c0_9, %c0_10] : memref<2x128xf32, #tpu.memory_space<vmem>>, vector<2x128xf32>
      %13 = arith.truncf %12 : vector<2x128xf32> to vector<2x128xbf16>
      %c0_11 = arith.constant 0 : index
      %c0_12 = arith.constant 0 : index
      %14 = vector.load %arg5[%c0_11, %c0_12] : memref<2x128xbf16, #tpu.memory_space<vmem>>, vector<2x128xbf16>
      tpu.vector_store %arg5[%c0_11, %c0_12], %13 {strides = array<i32>} : memref<2x128xbf16, #tpu.memory_space<vmem>>, vector<2x128xbf16>,
    } else {
    }
    return
  }
  func.func @transform_0(%arg0: i32, %arg1: i32) -> (i32, i32) {
    %c0_i32 = arith.constant 0 : i32
    %c0_i32_0 = arith.constant 0 : i32
    return %c0_i32, %arg1 : i32, i32
  }
  func.func @transform_1(%arg0: i32, %arg1: i32) -> (i32, i32) {
    %c0_i32 = arith.constant 0 : i32
    return %arg1, %arg0 : i32, i32
  }
  func.func @transform_2(%arg0: i32, %arg1: i32) -> (i32, i32) {
    %c0_i32 = arith.constant 0 : i32
    %c0_i32_0 = arith.constant 0 : i32
    return %c0_i32, %arg0 : i32, i32
  }
  func.func @transform_3(%arg0: i32, %arg1: i32) -> (i32, i32) {
    %c0_i32 = arith.constant 0 : i32
    %c0_i32_0 = arith.constant 0 : i32
    return %c0_i32, %arg0 : i32, i32
  }
}

module attributes {stable_mosaic.version = 11 : i64} {
  func.func @_linear_kernel(%arg0: i32, %arg1: i32, %arg2: memref<2x128xbf16, #tpu.memory_space<vmem>>, %arg3: memref<128x128xbf16, #tpu.memory_space<vmem>>, %arg4: memref<1x128xf32, #tpu.memory_space<vmem>>, %arg5: memref<2x128xbf16, #tpu.memory_space<vmem>>, %arg6: memref<2x128xf32, #tpu.memory_space<vmem>>) attributes {dimension_semantics = [#tpu.dimension_semantics<parallel>, #tpu.dimension_semantics<arbitrary>], iteration_bounds = array<i64: 3, 3>, scalar_prefetch = 0 : i64, scratch_operands = 1 : i64, tpu.core_type = #tpu.core_type<tc>, window_params = [{transform_indices = @transform_0, window_bounds = array<i64: 2, 128>}, {transform_indices = @transform_1, window_bounds = array<i64: 128, 128>}, {transform_indices = @transform_2, window_bounds = array<i64: 1, 128>}, {transform_indices = @transform_3, window_bounds = array<i64: 2, 128>}]} {
    %c0_i32 = arith.constant 0 : i32
    %0 = arith.cmpi eq, %arg1, %c0_i32 : i32
    %1 = arith.extui %0 : i1 to i32
    %c0_i32_0 = arith.constant 0 : i32
    %2 = arith.cmpi ne, %1, %c0_i32_0 : i32
    scf.if %2 {
      %c0_9 = arith.constant 0 : index
      %c0_10 = arith.constant 0 : index
      %12 = vector.load %arg4[%c0_9, %c0_10] : memref<1x128xf32, #tpu.memory_space<vmem>>, vector<1x128xf32>
      %13 = vector.shape_cast %12 : vector<1x128xf32> to vector<1x128xf32>
      %14 = vector.broadcast %13 : vector<1x128xf32> to vector<2x128xf32>
      %c0_11 = arith.constant 0 : index
      %c0_12 = arith.constant 0 : index
      %15 = vector.load %arg6[%c0_11, %c0_12] : memref<2x128xf32, #tpu.memory_space<vmem>>, vector<2x128xf32>
      tpu.vector_store %arg6[%c0_11, %c0_12], %14 {strides = array<i32>} : memref<2x128xf32, #tpu.memory_space<vmem>>, vector<2x128xf32>,
    } else {
    }
    %c0 = arith.constant 0 : index
    %c0_1 = arith.constant 0 : index
    %3 = vector.load %arg6[%c0, %c0_1] : memref<2x128xf32, #tpu.memory_space<vmem>>, vector<2x128xf32>
    %c0_2 = arith.constant 0 : index
    %c0_3 = arith.constant 0 : index
    %4 = vector.load %arg2[%c0_2, %c0_3] : memref<2x128xbf16, #tpu.memory_space<vmem>>, vector<2x128xbf16>
    %c0_4 = arith.constant 0 : index
    %c0_5 = arith.constant 0 : index
    %5 = vector.load %arg3[%c0_4, %c0_5] : memref<128x128xbf16, #tpu.memory_space<vmem>>, vector<128x128xbf16>
    %cst = arith.constant dense<0.000000e+00> : vector<2x128xf32>
    %6 = tpu.matmul %4, %5, %cst {dimension_numbers = #tpu.dot_dimension_numbers<[1], [0], [0], [1], [0, 0, 1, 1], [], []>} : vector<2x128xbf16>, vector<128x128xbf16>, vector<2x128xf32> -> vector<2x128xf32>
    %7 = arith.addf %3, %6 : vector<2x128xf32>
    %c0_6 = arith.constant 0 : index
    %c0_7 = arith.constant 0 : index
    %8 = vector.load %arg6[%c0_6, %c0_7] : memref<2x128xf32, #tpu.memory_space<vmem>>, vector<2x128xf32>
    tpu.vector_store %arg6[%c0_6, %c0_7], %7 {strides = array<i32>} : memref<2x128xf32, #tpu.memory_space<vmem>>, vector<2x128xf32>,
    %c2_i32 = arith.constant 2 : i32
    %9 = arith.cmpi eq, %arg1, %c2_i32 : i32
    %10 = arith.extui %9 : i1 to i32
    %c0_i32_8 = arith.constant 0 : i32
    %11 = arith.cmpi ne, %10, %c0_i32_8 : i32
    scf.if %11 {
      %c0_9 = arith.constant 0 : index
      %c0_10 = arith.constant 0 : index
      %12 = vector.load %arg6[%c0_9, %c0_10] : memref<2x128xf32, #tpu.memory_space<vmem>>, vector<2x128xf32>
      %13 = arith.truncf %12 : vector<2x128xf32> to vector<2x128xbf16>
      %c0_11 = arith.constant 0 : index
      %c0_12 = arith.constant 0 : index
      %14 = vector.load %arg5[%c0_11, %c0_12] : memref<2x128xbf16, #tpu.memory_space<vmem>>, vector<2x128xbf16>
      tpu.vector_store %arg5[%c0_11, %c0_12], %13 {strides = array<i32>} : memref<2x128xbf16, #tpu.memory_space<vmem>>, vector<2x128xbf16>,
    } else {
    }
    return
  }
  func.func @transform_0(%arg0: i32, %arg1: i32) -> (i32, i32) {
    %c0_i32 = arith.constant 0 : i32
    %c0_i32_0 = arith.constant 0 : i32
    return %c0_i32, %arg1 : i32, i32
  }
  func.func @transform_1(%arg0: i32, %arg1: i32) -> (i32, i32) {
    %c0_i32 = arith.constant 0 : i32
    return %arg1, %arg0 : i32, i32
  }
  func.func @transform_2(%arg0: i32, %arg1: i32) -> (i32, i32) {
    %c0_i32 = arith.constant 0 : i32
    %c0_i32_0 = arith.constant 0 : i32
    return %c0_i32, %arg0 : i32, i32
  }
  func.func @transform_3(%arg0: i32, %arg1: i32) -> (i32, i32) {
    %c0_i32 = arith.constant 0 : i32
    %c0_i32_0 = arith.constant 0 : i32
    return %c0_i32, %arg0 : i32, i32
  }
}

module attributes {stable_mosaic.version = 11 : i64} {
  func.func @_head_kernel(%arg0: i32, %arg1: memref<2x128xbf16, #tpu.memory_space<vmem>>, %arg2: memref<128x256xbf16, #tpu.memory_space<vmem>>, %arg3: memref<1x256xf32, #tpu.memory_space<vmem>>, %arg4: memref<2x32xf32, #tpu.memory_space<vmem>>, %arg5: memref<2x128xf32, #tpu.memory_space<vmem>>, %arg6: memref<2x256xf32, #tpu.memory_space<vmem>>) attributes {dimension_semantics = [#tpu.dimension_semantics<arbitrary>], iteration_bounds = array<i64: 3>, scalar_prefetch = 0 : i64, scratch_operands = 1 : i64, tpu.core_type = #tpu.core_type<tc>, window_params = [{transform_indices = @transform_0, window_bounds = array<i64: 2, 128>}, {transform_indices = @transform_1, window_bounds = array<i64: 128, 256>}, {pipeline_mode = #tpu.pipeline_mode<synchronous>, transform_indices = @transform_2, window_bounds = array<i64: 1, 256>}, {pipeline_mode = #tpu.pipeline_mode<synchronous>, transform_indices = @transform_3, window_bounds = array<i64: 2, 32>}, {pipeline_mode = #tpu.pipeline_mode<synchronous>, transform_indices = @transform_4, window_bounds = array<i64: 2, 128>}]} {
    %c0_i32 = arith.constant 0 : i32
    %0 = arith.cmpi eq, %arg0, %c0_i32 : i32
    %1 = arith.extui %0 : i1 to i32
    %c0_i32_0 = arith.constant 0 : i32
    %2 = arith.cmpi ne, %1, %c0_i32_0 : i32
    scf.if %2 {
      %c0_9 = arith.constant 0 : index
      %c0_10 = arith.constant 0 : index
      %12 = vector.load %arg3[%c0_9, %c0_10] : memref<1x256xf32, #tpu.memory_space<vmem>>, vector<1x256xf32>
      %13 = vector.shape_cast %12 : vector<1x256xf32> to vector<1x256xf32>
      %14 = vector.broadcast %13 : vector<1x256xf32> to vector<2x256xf32>
      %c0_11 = arith.constant 0 : index
      %c0_12 = arith.constant 0 : index
      %15 = vector.load %arg6[%c0_11, %c0_12] : memref<2x256xf32, #tpu.memory_space<vmem>>, vector<2x256xf32>
      tpu.vector_store %arg6[%c0_11, %c0_12], %14 {strides = array<i32>} : memref<2x256xf32, #tpu.memory_space<vmem>>, vector<2x256xf32>,
    } else {
    }
    %c0 = arith.constant 0 : index
    %c0_1 = arith.constant 0 : index
    %3 = vector.load %arg6[%c0, %c0_1] : memref<2x256xf32, #tpu.memory_space<vmem>>, vector<2x256xf32>
    %c0_2 = arith.constant 0 : index
    %c0_3 = arith.constant 0 : index
    %4 = vector.load %arg1[%c0_2, %c0_3] : memref<2x128xbf16, #tpu.memory_space<vmem>>, vector<2x128xbf16>
    %c0_4 = arith.constant 0 : index
    %c0_5 = arith.constant 0 : index
    %5 = vector.load %arg2[%c0_4, %c0_5] : memref<128x256xbf16, #tpu.memory_space<vmem>>, vector<128x256xbf16>
    %cst = arith.constant dense<0.000000e+00> : vector<2x256xf32>
    %6 = tpu.matmul %4, %5, %cst {dimension_numbers = #tpu.dot_dimension_numbers<[1], [0], [0], [1], [0, 0, 1, 1], [], []>} : vector<2x128xbf16>, vector<128x256xbf16>, vector<2x256xf32> -> vector<2x256xf32>
    %7 = arith.addf %3, %6 : vector<2x256xf32>
    %c0_6 = arith.constant 0 : index
    %c0_7 = arith.constant 0 : index
    %8 = vector.load %arg6[%c0_6, %c0_7] : memref<2x256xf32, #tpu.memory_space<vmem>>, vector<2x256xf32>
    tpu.vector_store %arg6[%c0_6, %c0_7], %7 {strides = array<i32>} : memref<2x256xf32, #tpu.memory_space<vmem>>, vector<2x256xf32>,
    %c2_i32 = arith.constant 2 : i32
    %9 = arith.cmpi eq, %arg0, %c2_i32 : i32
    %10 = arith.extui %9 : i1 to i32
    %c0_i32_8 = arith.constant 0 : i32
    %11 = arith.cmpi ne, %10, %c0_i32_8 : i32
    scf.if %11 {
      %c0_9 = arith.constant 0 : index
      %c0_10 = arith.constant 0 : index
      %12 = vector.load %arg6[%c0_9, %c0_10] : memref<2x256xf32, #tpu.memory_space<vmem>>, vector<2x256xf32>
      %13 = vector.extract_strided_slice %12 {offsets = [0, 0], sizes = [2, 32], strides = [1, 1]} : vector<2x256xf32> to vector<2x32xf32>
      %14 = vector.shape_cast %13 : vector<2x32xf32> to vector<2x4x8xf32>
      %cst_11 = arith.constant dense<0xFF800000> : vector<2x4xf32>
      %15 = vector.multi_reduction <maximumf>, %14, %cst_11 [2] : vector<2x4x8xf32> to vector<2x4xf32>
      %16 = vector.shape_cast %15 : vector<2x4xf32> to vector<2x4x1xf32>
      %17 = vector.broadcast %16 : vector<2x4x1xf32> to vector<2x4x8xf32>
      %18 = arith.subf %14, %17 : vector<2x4x8xf32>
      %19 = math.exp %18 : vector<2x4x8xf32>
      %cst_12 = arith.constant dense<0.000000e+00> : vector<2x4xf32>
      %20 = vector.multi_reduction <add>, %19, %cst_12 [2] : vector<2x4x8xf32> to vector<2x4xf32>
      %21 = vector.shape_cast %20 : vector<2x4xf32> to vector<2x4x1xf32>
      %22 = vector.broadcast %21 : vector<2x4x1xf32> to vector<2x4x8xf32>
      %23 = arith.divf %19, %22 : vector<2x4x8xf32>
      %24 = vector.shape_cast %23 : vector<2x4x8xf32> to vector<2x32xf32>
      %c0_13 = arith.constant 0 : index
      %c0_14 = arith.constant 0 : index
      %25 = vector.load %arg4[%c0_13, %c0_14] : memref<2x32xf32, #tpu.memory_space<vmem>>, vector<2x32xf32>
      tpu.vector_store %arg4[%c0_13, %c0_14], %24 {strides = array<i32>} : memref<2x32xf32, #tpu.memory_space<vmem>>, vector<2x32xf32>,
      %26 = vector.extract_strided_slice %12 {offsets = [0, 128], sizes = [2, 128], strides = [1, 1]} : vector<2x256xf32> to vector<2x128xf32>
      %c0_15 = arith.constant 0 : index
      %c0_16 = arith.constant 0 : index
      %27 = vector.load %arg5[%c0_15, %c0_16] : memref<2x128xf32, #tpu.memory_space<vmem>>, vector<2x128xf32>
      tpu.vector_store %arg5[%c0_15, %c0_16], %26 {strides = array<i32>} : memref<2x128xf32, #tpu.memory_space<vmem>>, vector<2x128xf32>,
    } else {
    }
    return
  }
  func.func @transform_0(%arg0: i32) -> (i32, i32) {
    %c0_i32 = arith.constant 0 : i32
    %c0_i32_0 = arith.constant 0 : i32
    return %c0_i32, %arg0 : i32, i32
  }
  func.func @transform_1(%arg0: i32) -> (i32, i32) {
    %c0_i32 = arith.constant 0 : i32
    %c0_i32_0 = arith.constant 0 : i32
    return %arg0, %c0_i32 : i32, i32
  }
  func.func @transform_2(%arg0: i32) -> (i32, i32) {
    %c0_i32 = arith.constant 0 : i32
    %c0_i32_0 = arith.constant 0 : i32
    %c0_i32_1 = arith.constant 0 : i32
    return %c0_i32, %c0_i32_0 : i32, i32
  }
  func.func @transform_3(%arg0: i32) -> (i32, i32) {
    %c0_i32 = arith.constant 0 : i32
    %c0_i32_0 = arith.constant 0 : i32
    %c0_i32_1 = arith.constant 0 : i32
    return %c0_i32, %c0_i32_0 : i32, i32
  }
  func.func @transform_4(%arg0: i32) -> (i32, i32) {
    %c0_i32 = arith.constant 0 : i32
    %c0_i32_0 = arith.constant 0 : i32
    %c0_i32_1 = arith.constant 0 : i32
    return %c0_i32, %c0_i32_0 : i32, i32
  }
}

</mosaic_0001>

<bundles_post_ra>
// kernel: fastrcnn_forward.4
= control target key start
LH: loop header
LB: loop body
LE: loop exit
PB: predicated region body
PF: predicated region fallthrough
CT: control target
= control target key end

     0   :  { %s723_s12 = smov 0   ;;  %s725_s13 = smov 0   ;;  %s857_s0 = inlined_call_operand.vmem [shape: bf16[2,384], index: 0, kind: input, shape index: {}]   ;;  %s858_s1 = inlined_call_operand.vmem [shape: bf16[384,384], index: 1, kind: input, shape index: {}]   ;;  %s859_s2 = inlined_call_operand.vmem [shape: f32[1,384], index: 2, kind: input, shape index: {}]   ;;  %s860_s3 = inlined_call_operand.vmem [shape: bf16[2,384], index: 3, kind: output, shape index: {}]  }
   0x1   :  { %s727_s14 = smov 0   ;;  %s729_s15 = smov 0  }
   0x2   :  { %s731_s16 = smov 0   ;;  %s733_s17 = smov 0  }
   0x3   :  { %s735_s18 = smov 0  }
   0x4 LB: > { %s22_s19 = sadd.s32 1, %s691_s16  ;;  %s25_s20 = sadd.s32 1, %s695_s17  ;;  %s699_s18 = sphi %s735_s18, %s13_s18   ;;  %s695_s17 = sphi %s733_s17, %s866_s17   ;;  %s691_s16 = sphi %s731_s16, %s865_s16   ;;  %s687_s15 = sphi %s729_s15, %s864_s15   ;;  %s683_s14 = sphi %s727_s14, %s863_s14   ;;  %s679_s13 = sphi %s725_s13, %s862_s13   ;;  %s675_s12 = sphi %s723_s12, %s861_s12  }
   0x5   : > { %p23_p0 = scmp.ge.s32.totalorder %s22_s19, 3  ;;  %p67_p1 = scmp.ne.s32.totalorder %s679_s13, %s675_s12 }
   0x6   : > { %p68_p2 = scmp.eq.s32.totalorder %s699_s18, 0  ;;  %s60_s24 = sadd.s32 1, %s679_s13 }
   0x7   : > { %s868_s19 = smov (%p23_p0, %s22_s19), 0  ;;  %s870_s20 = smov (!%p23_p0, %s25_s20), %s695_s17 }
   0x8   : > { %p69_p3 = por %p68_p2, %p67_p1  ;;  %p27_p4 = scmp.ge.s32.totalorder %s870_s20, 3 }
   0x9   : > { %s55_s21 = ssub.s32 %s691_s16, %s868_s19  ;;  %p529_p6 = scmp.ge.s32.totalorder %s699_s18, 9 }
   0xa   : > { %s872_s20 = smov (%p27_p4, %s870_s20), 0 }
   0xb   : > { %s56_s22 = ssub.s32 %s695_s17, %s872_s20  ;;  %145 = sbr.rel (%p529_p6) target bundleno = 35 (0x23), region = 16 }
   0xc   : > { %s57_s23 = sor.u32 %s56_s22, %s55_s21 }
   0xd   : > { %p58_p5 = scmp.eq.s32.totalorder %s57_s23, 0 }
   0xf   : > { %s774_s25 = scalar_select %p58_p5, %s679_s13, %s60_s24  }
  0x12   : > { %154 = sbr.rel (!%p69_p3) target bundleno = 35 (0x23), region = 24  ;;  %s156_s26 = sand.u32 (%p69_p3), 1, %s679_s13  }
  0x13   : > { %s578_s27 = smul.u32 (%p69_p3), 48, %s691_s16  ;;  %s530_s28 = sshll.u32 (%p69_p3), %s156_s26, 6 }
  0x14   : > { %s158_s7 = scalar_lea.vmem (%p69_p3), [#allocation3], %s530_s28 }
  0x15   : > { %s161_s29 = sadd.s32 (%p69_p3), %s695_s17, %s578_s27 }
  0x16   : > { %s533_s30 = sshll.u32 (%p69_p3), %s161_s29, 2 }
  0x17   : > { %s783_s6 = scalar_lea.vmem (%p69_p3), %s858_s1, %s533_s30 }
  0x18   : > { %v179_v0 = vld [vmem:[%s783_s6] sm:$0xf] (%p69_p3)  ;;  %v181_v1 = vld [vmem:[%s783_s6 + $0xc] sm:$0xf] (%p69_p3)  ;;  %v183_v2 = vld [vmem:[%s783_s6 + $0x18] sm:$0xf] (%p69_p3) }
  0x19   : > { %180 = vst [vmem:[%s158_s7] sm:$0xf] %v179_v0  ;;  %182 = vst [vmem:[%s158_s7 + $0x4] sm:$0xf] %v181_v1  ;;  %v185_v3 = vld [vmem:[%s783_s6 + $0x24] sm:$0xf] }
  0x1a   : > { %184 = vst [vmem:[%s158_s7 + $0x8] sm:$0xf] %v183_v2  ;;  %v187_v4 = vld [vmem:[%s783_s6 + $0x30] sm:$0xf]  ;;  %v189_v5 = vld [vmem:[%s783_s6 + $0x3c] sm:$0xf] }
  0x1b   : > { %186 = vst [vmem:[%s158_s7 + $0xc] sm:$0xf] %v185_v3  ;;  %188 = vst [vmem:[%s158_s7 + $0x10] sm:$0xf] %v187_v4  ;;  %v191_v6 = vld [vmem:[%s783_s6 + $0x48] sm:$0xf] }
  0x1c   : > { %190 = vst [vmem:[%s158_s7 + $0x14] sm:$0xf] %v189_v5  ;;  %v193_v7 = vld [vmem:[%s783_s6 + $0x54] sm:$0xf]  ;;  %v195_v8 = vld [vmem:[%s783_s6 + $0x60] sm:$0xf] }
  0x1d   : > { %192 = vst [vmem:[%s158_s7 + $0x18] sm:$0xf] %v191_v6  ;;  %194 = vst [vmem:[%s158_s7 + $0x1c] sm:$0xf] %v193_v7  ;;  %v197_v9 = vld [vmem:[%s783_s6 + $0x6c] sm:$0xf] }
  0x1e   : > { %196 = vst [vmem:[%s158_s7 + $0x20] sm:$0xf] %v195_v8  ;;  %v199_v10 = vld [vmem:[%s783_s6 + $0x78] sm:$0xf]  ;;  %v201_v11 = vld [vmem:[%s783_s6 + $0x84] sm:$0xf] }
  0x1f   : > { %198 = vst [vmem:[%s158_s7 + $0x24] sm:$0xf] %v197_v9  ;;  %200 = vst [vmem:[%s158_s7 + $0x28] sm:$0xf] %v199_v10  ;;  %v203_v12 = vld [vmem:[%s783_s6 + $0x90] sm:$0xf] }
  0x20   : > { %202 = vst [vmem:[%s158_s7 + $0x2c] sm:$0xf] %v201_v11  ;;  %v205_v13 = vld [vmem:[%s783_s6 + $0x9c] sm:$0xf]  ;;  %v207_v14 = vld [vmem:[%s783_s6 + $0xa8] sm:$0xf] }
  0x21   : > { %204 = vst [vmem:[%s158_s7 + $0x30] sm:$0xf] %v203_v12  ;;  %206 = vst [vmem:[%s158_s7 + $0x34] sm:$0xf] %v205_v13  ;;  %v209_v15 = vld [vmem:[%s783_s6 + $0xb4] sm:$0xf] }
  0x22   : > { %208 = vst [vmem:[%s158_s7 + $0x38] sm:$0xf] %v207_v14  ;;  %210 = vst [vmem:[%s158_s7 + $0x3c] sm:$0xf] %v209_v15 }
  0x23 PF: > { %p534_p7 = scmp.ge.s32.totalorder %s699_s18, 1  ;;  %p270_p8 = scmp.lt.s32.totalorder %s699_s18, 10 }
  0x25   : > { %p271_p9 = pnand %p534_p7, %p270_p8 }
  0x26   : > { %s277_s8 = sand.u32 (!%p271_p9), 1, %s675_s12   ;;  %p304_p10 = scmp.lt.s32.totalorder (!%p271_p9), %s683_s14, 2 }
  0x27   : > { %274 = sbr.rel (%p271_p9) target bundleno = 312 (0x138), region = 69  ;;  %s535_s9 = sshll.u32 (!%p271_p9), %s277_s8, 6 }
  0x28   : > { %p308_p11 = scmp.lt.s32.totalorder (!%p271_p9), %s687_s15, 2  ;;  %s279_s29 = scalar_lea.vmem (!%p271_p9), [#allocation3], %s535_s9 }
  0x29   : > { %p536_p12 = scmp.ne.s32.totalorder (!%p271_p9), %s683_s14, 0 }
  0x2e   : > { %s807_s10 = scalar_select %p304_p10, %s683_s14, 2 }
  0x2f   : > { %s874_s15 = smov (!%p308_p11, %s687_s15), 2  ;;  %318 = sbr.rel (%p536_p12) target bundleno = 54 (0x36), region = 77 }
  0x30   : > { %s306_s22 = scalar_lea.vmem %s857_s0, %s807_s10  ;;  %s310_s26 = scalar_lea.vmem %s859_s2, %s874_s15 }
  0x31   : > { %s313_s28 = scalar_lea.vmem %s860_s3, %s874_s15  ;;  %v537_v16 = vld [vmem:[%s310_s26] ss:$0 sm:$0xff] (!%p536_p12) }
  0x32   : > { %326 = vst [vmem:[#allocation2] sm:$0x3] (!%p536_p12), %v537_v16 }
  0x36 PF: > { %v637_v17 = vld [vmem:[%s279_s29] sm:$0xff]   ;;  %v701_v18 = vmov 0.0   ;;  %v638_v19 = vld [vmem:[%s279_s29 + $0x8] sm:$0xff]   ;;  %vm702_vm0 = vmmov 0   ;;  %v639_v20 = vld [vmem:[%s279_s29 + $0x10] sm:$0xff]   ;;  %p546_p13 = scmp.ne.s32.totalorder %s683_s14, 2 }
  0x37   : > { %558 = vmatprep.subr.bf16.mxu0 %v701_v18  ;;  %574 = vmatprep.mubr.msk.bf16.mxu0 %vm702_vm0, %v701_v18  ;;  %v640_v21 = vld [vmem:[%s279_s29 + $0x18] sm:$0xff]   ;;  %v641_v22 = vld [vmem:[%s279_s29 + $0x20] sm:$0xff]   ;;  %v642_v23 = vld [vmem:[%s279_s29 + $0x28] sm:$0xff]  }
  0x38   : > { %559 = vmatpush3.bf16.msra.mxu0 %v637_v17  ;;  %v643_v24 = vld [vmem:[%s279_s29 + $0x30] sm:$0xff]   ;;  %v644_v25 = vld [vmem:[%s279_s29 + $0x38] sm:$0xff]  }
  0x39   : > { %560 = vmatprep.subr.bf16.mxu0 %v701_v18  ;;  %v328_v26 = vld [vmem:[%s306_s22] sm:$0x1] }
  0x3a   : > { %v327_v27 = vld [vmem:[#allocation2] sm:$0x3] }
  0x3c   : > { %561 = vmatpush3.bf16.msra.mxu0 %v638_v19 }
  0x3d   : > { %562 = vmatprep.subr.bf16.mxu0 %v701_v18 }
  0x40   : > { %563 = vmatpush3.bf16.msra.mxu0 %v639_v20 }
  0x41   : > { %564 = vmatprep.subr.bf16.mxu0 %v701_v18 }
  0x44   : > { %565 = vmatpush3.bf16.msra.mxu0 %v640_v21 }
  0x45   : > { %566 = vmatprep.subr.bf16.mxu0 %v701_v18 }
  0x48   : > { %567 = vmatpush3.bf16.msra.mxu0 %v641_v22 }
  0x49   : > { %568 = vmatprep.subr.bf16.mxu0 %v701_v18 }
  0x4c   : > { %569 = vmatpush3.bf16.msra.mxu0 %v642_v23 }
  0x4d   : > { %570 = vmatprep.subr.bf16.mxu0 %v701_v18 }
  0x50   : > { %571 = vmatpush3.bf16.msra.mxu0 %v643_v24 }
  0x51   : > { %572 = vmatprep.subr.bf16.mxu0 %v701_v18 }
  0x54   : > { %573 = vmatpush3.bf16.msra.mxu0 %v644_v25 }
  0x57   : > { %575 = vmatmul.mubr.bf16.vlgmr.msra.gmra.mrb[0].mxu0 %v328_v26 }
 0x127   : > { %438 = sbr.rel (%p546_p13) target bundleno = 312 (0x138), region = 81 }
 0x12a   : > { %v427_v28 = vpop.f32.mrb[0].mxu0 }
 0x12b   : > { %v433_v29 = vadd.f32 %v427_v28, %v327_v27  ;;  %v576_v30 = vpop.f32.mrb[1].mxu0 }
 0x12c   : > { %v430_v31 = vpop.f32.mrb[2].mxu0 }
 0x12d   : > { %434 = vst [vmem:[#allocation2] sm:$0x3] %v433_v29  ;;  %v577_v32 = vpop.f32.mrb[3].mxu0 }
 0x134   : > { %v439_v33 = vld [vmem:[#allocation2] sm:$0x3] }
 0x135   : > { %v440_v34 = vpack.c.bf16 %v439_v33, %v439_v33 }
 0x137   : > { %441 = vst [vmem:[%s313_s28] sm:$0x1] %v440_v34 }
 0x138 PF: > { %s13_s18 = sadd.s32 1, %s699_s18   ;;  %s861_s12 = smov %s679_s13 }
 0x139   : > { %p10_p0 = scmp.ge.s32.totalorder %s13_s18, 11   ;;  %s862_s13 = smov %s774_s25 }
 0x13a   : > { %s863_s14 = smov %s691_s16  ;;  %s864_s15 = smov %s695_s17 }
 0x13b   : > { %s865_s16 = smov %s868_s19  ;;  %s866_s17 = smov %s872_s20 }
 0x13c   :  { %12 = sbr.rel (!%p10_p0) target bundleno = 4 (0x4), region = 122 }

// kernel: fastrcnn_forward.3
= control target key start
LH: loop header
LB: loop body
LE: loop exit
PB: predicated region body
PF: predicated region fallthrough
CT: control target
= control target key end

     0   :  { %s1120_s0 = inlined_call_operand.vmem [shape: bf16[2,1664], index: 0, kind: input, shape index: {}]   ;;  %s1121_s1 = inlined_call_operand.hbm [shape: bf16[1664,384], index: 1, kind: input, shape index: {}]   ;;  %s1122_s2 = inlined_call_operand.hbm [shape: f32[1,384], index: 2, kind: input, shape index: {}]   ;;  %s1123_s3 = inlined_call_operand.vmem [shape: bf16[2,384], index: 3, kind: output, shape index: {}]  }
   0x1   :  { %1129 = sst [smem:[#allocation10_spill]] %s1121_s1 }
   0x2   :  { %8 = vsyncpa [#allocation4], 0 }
   0x3   :  { %10 = vsyncpa [#allocation4 + $0x1], 0 }
   0x4   :  { %11 = vsyncpa [#allocation6], 0 }
   0x5   :  { %13 = vsyncpa [#allocation6 + $0x1], 0  ;;  %s831_s12 = smov 0   ;;  %s833_s13 = smov 0  }
   0x6   :  { %s835_s14 = smov 0   ;;  %s837_s15 = smov 0  }
   0x7   :  { %s839_s16 = smov 0   ;;  %s841_s17 = smov 0  }
   0x8   :  { %s843_s18 = smov 0   ;;  %s845_s19 = smov 0  }
   0x9   :  { %s847_s20 = smov 0   ;;  %s849_s21 = smov 0  }
   0xa   :  { %s851_s22 = smov 0  }
   0xb LB: > { %s28_s23 = sadd.s32 1, %s794_s20  ;;  %s66_s24 = sadd.s32 1, %s782_s17  ;;  %s802_s22 = sphi %s851_s22, %s19_s22   ;;  %s798_s21 = sphi %s849_s21, %s1154_s21   ;;  %s794_s20 = sphi %s847_s20, %s1153_s20   ;;  %s790_s19 = sphi %s845_s19, %s1152_s19   ;;  %s786_s18 = sphi %s843_s18, %s1151_s18   ;;  %s782_s17 = sphi %s841_s17, %s1150_s17   ;;  %s778_s16 = sphi %s839_s16, %s1149_s16   ;;  %s774_s15 = sphi %s837_s15, %s1148_s15   ;;  %s770_s14 = sphi %s835_s14, %s1147_s14   ;;  %s766_s13 = sphi %s833_s13, %s1146_s13   ;;  %s762_s12 = sphi %s831_s12, %s1145_s12  }
   0xc   : > { %p888_p0 = scmp.ge.s32.totalorder %s28_s23, 13  ;;  %p73_p1 = scmp.ne.s32.totalorder %s782_s17, %s778_s16 }
   0xd   : > { %p1125_p2 = scmp.eq.s32.totalorder %s802_s22, 0  ;;  %p1124_p4 = scmp.lt.s32.totalorder %s802_s22, 39 }
   0xe   : > { %s1156_s23 = smov (%p888_p0, %s28_s23), 0  ;;  %s161_s27 = sand.u32 1, %s782_s17  }
   0xf   : > { %p75_p3 = por %p1125_p2, %p73_p1  ;;  %s61_s26 = ssub.s32 %s794_s20, %s1156_s23 }
  0x10   : > { %s485_s28 = sshll.u32 %s161_s27, 6  ;;  %s534_s29 = smul.u32 48, %s794_s20 }
  0x11   : > { %s165_s30 = scalar_lea.vmem [#allocation3], %s485_s28  ;;  %p908_p5 = pnand %p1124_p4, %p75_p3 }
  0x12   : > { %s174_s4 = sshll.u32 %s165_s30, 4  ;;  %s171_s6 = sadd.s32 %s798_s21, %s534_s29  ;;  %s913_s4 = int_to_ptr.vmem [resolvable:$true] %s174_s4 }
  0x13   : > { %s488_s7 = sshll.u32 %s171_s6, 6  ;;  %s1132_s1 = sld [smem:[#allocation10_spill]] }
  0x14   : > { %s920_s11 = scalar_lea.sflag [#allocation4], %s161_s27  ;;  %p650_p7 = pneg %p908_p5 }
  0x19   : > { %s918_s10 = scalar_lea.hbm %s1132_s1, %s488_s7  ;;  %s653_s6 = scalar_lea.hbm %s1132_s1, 39936 }
  0x1a   : > { %s648_s28 = scalar_lea.hbm %s918_s10, 1024  ;;  %p654_p10 = scmp.lt.u32.totalorder %s918_s10, %s1132_s1 }
  0x1b   : > { %p649_p6 = scmp.ne.s32.totalorder %s918_s10, %s648_s28  ;;  %p655_p11 = scmp.lt.u32.totalorder %s653_s6, %s648_s28 }
  0x1c   : > { %p657_p13 = scmp.lt.u32.totalorder %s648_s28, %s918_s10 }
  0x1d   : > { %p651_p8 = pnand %p650_p7, %p649_p6  ;;  %p656_p12 = por %p655_p11, %p654_p10 }
  0x1f   : > { %p652_p9 = pneg %p651_p8  ;;  %p658_p1 = por %p657_p13, %p656_p12 }
  0x21   : > { %p659_p3 = pnand %p658_p1, %p652_p9 }
  0x23   : > { %662 = shalt.err (!%p659_p3)
}
  0x24   : > { %s663_s27 = scalar_lea.vmem %s913_s4, 1024  ;;  %s804_s9 = smov [#allocation3]  }
  0x25   : > { %p664_p6 = scmp.ne.s32.totalorder %s913_s4, %s663_s27  ;;  %s668_s29 = sshll.u32 %s804_s9, 4  ;;  %s669_s29 = int_to_ptr.vmem [resolvable:$false] %s668_s29 }
  0x26   : > { %s670_s30 = scalar_lea.vmem %s669_s29, 2048  ;;  %p671_p2 = scmp.lt.s32.totalorder %s913_s4, %s669_s29 }
  0x27   : > { %p666_p8 = pnand %p664_p6, %p650_p7  ;;  %p672_p10 = scmp.lt.s32.totalorder %s670_s30, %s663_s27 }
  0x29   : > { %p667_p4 = pneg %p666_p8  ;;  %p673_p11 = por %p672_p10, %p671_p2 }
  0x2b   : > { %p674_p12 = pnand %p673_p11, %p667_p4 }
  0x2d   : > { %677 = shalt.err (!%p674_p12)
}
  0x2e   : > { %s805_s28 = smov 192   ;;  %s806_s6 = smov 64  }
  0x2f   : > { %s807_s7 = smov 4   ;;  %p490_p2 = scmp.ge.s32.totalorder %s802_s22, 1 }
  0x30   : > { %542 = dma.hbm_to_vmem [thread:$0]  (!%p908_p5), %s918_s10, 1024, %s913_s4, %s920_s11, %s805_s28, %s806_s6, %s807_s7  }
  0x31   : > { %p199_p4 = scmp.lt.s32.totalorder %s802_s22, 40  ;;  %s481_s27 = sadd.s32 4294967295, %s802_s22  }
  0x32   : > { %s31_s9 = sadd.s32 1, %s798_s21  ;;  %p79_p9 = scmp.ne.s32.totalorder %s778_s16, %s774_s15 }
  0x33   : > { %p950_p7 = pnand %p490_p2, %p199_p4  ;;  %s1158_s9 = smov (!%p888_p0, %s31_s9), %s798_s21 }
  0x34   : > { %p80_p13 = scmp.eq.s32.totalorder %s481_s27, 0  ;;  %s92_s4 = sadd.s32 1, %s770_s14 }
  0x35   : > { %p33_p5 = scmp.ge.s32.totalorder %s1158_s9, 3  ;;  %p99_p1 = scmp.ne.s32.totalorder %s770_s14, %s766_s13 }
  0x36   : > { %p964_p3 = por %p80_p13, %p79_p9  ;;  %p105_p6 = scmp.ne.s32.totalorder %s766_s13, %s762_s12 }
  0x37   : > { %s1160_s9 = smov (%p33_p5, %s1158_s9), 0  ;;  %p1136_p8 = scmp.eq.s32.totalorder %s802_s22, 0 }
  0x38   : > { %s1134_s5 = scalar_select %p964_p3, 1, 0 }
  0x39   : > { %1135 = sst [smem:[#allocation9_spill]] %s1160_s9  ;;  %p974_p10 = por %p99_p1, %p1136_p8 }
  0x3a   : > { %p978_p0 = por %p105_p6, %p80_p13  ;;  %s62_s10 = ssub.s32 %s798_s21, %s1160_s9 }
  0x3b   : > { %s184_s11 = sand.u32 1, %s770_s14   ;;  %s63_s29 = sor.u32 %s62_s10, %s61_s26 }
  0x3c   : > { %s1138_s25 = scalar_select %p978_p0, 1, 0 }
  0x3d   : > { %p90_p11 = scmp.eq.s32.totalorder %s62_s10, 0  ;;  %p64_p12 = scmp.eq.s32.totalorder %s63_s29, 0 }
  0x3e   : > { %s489_s28 = sshll.u32 %s798_s21, 4  ;;  %s187_s1 = scalar_lea.vmem [#allocation5], %s184_s11 }
  0x3f   : > { %s989_s12 = scalar_select %p90_p11, %s770_s14, %s92_s4  }
  0x40   : > { %s994_s30 = scalar_select %p64_p12, %s782_s17, %s66_s24  }
  0x41   : > { %s1000_s27 = scalar_lea.hbm %s1122_s2, %s489_s28  ;;  %s194_s9 = sshll.u32 %s187_s1, 4  ;;  %s1002_s9 = int_to_ptr.vmem [resolvable:$true] %s194_s9 }
  0x42   : > { %p1139_p2 = scmp.lt.s32.totalorder %s802_s22, 39  ;;  %s185_s24 = scalar_lea.sflag [#allocation6], %s184_s11 }
  0x43   : > { %s678_s4 = scalar_lea.hbm %s1000_s27, 16  ;;  %s683_s15 = scalar_lea.hbm %s1122_s2, 48 }
  0x44   : > { %p1008_p4 = pnand %p1139_p2, %p974_p10  ;;  %p679_p9 = scmp.ne.s32.totalorder %s1000_s27, %s678_s4 }
  0x45   : > { %p684_p6 = scmp.lt.u32.totalorder %s1000_s27, %s1122_s2  ;;  %p685_p8 = scmp.lt.u32.totalorder %s683_s15, %s678_s4 }
  0x46   : > { %p680_p13 = pneg %p1008_p4  ;;  %p687_p11 = scmp.lt.u32.totalorder %s678_s4, %s1000_s27 }
  0x47   : > { %p686_p10 = por %p685_p8, %p684_p6 }
  0x48   : > { %p681_p5 = pnand %p680_p13, %p679_p9 }
  0x49   : > { %p688_p12 = por %p687_p11, %p686_p10 }
  0x4a   : > { %p682_p1 = pneg %p681_p5 }
  0x4c   : > { %p689_p2 = pnand %p688_p12, %p682_p1 }
  0x4e   : > { %692 = shalt.err (!%p689_p2)
}
  0x4f   : > { %s693_s11 = scalar_lea.vmem %s1002_s9, 16  ;;  %s808_s6 = smov [#allocation5]  }
  0x50   : > { %p694_p9 = scmp.ne.s32.totalorder %s1002_s9, %s693_s11  ;;  %s698_s7 = sshll.u32 %s808_s6, 4  ;;  %s699_s7 = int_to_ptr.vmem [resolvable:$false] %s698_s7 }
  0x51   : > { %s700_s1 = scalar_lea.vmem %s699_s7, 32  ;;  %p701_p3 = scmp.lt.s32.totalorder %s1002_s9, %s699_s7 }
  0x52   : > { %p696_p5 = pnand %p694_p9, %p680_p13  ;;  %p702_p6 = scmp.lt.s32.totalorder %s700_s1, %s693_s11 }
  0x54   : > { %p697_p0 = pneg %p696_p5  ;;  %p703_p8 = por %p702_p6, %p701_p3 }
  0x56   : > { %p704_p10 = pnand %p703_p8, %p697_p0 }
  0x58   : > { %707 = shalt.err (!%p704_p10)
}
  0x59   : > { %545 = dma.hbm_to_vmem [thread:$0]  (!%p1008_p4), %s1000_s27, 16, %s1002_s9, %s185_s24  }
  0x5a   : > { %203 = sbr.rel (%p950_p7) target bundleno = 369 (0x171), region = 32  ;;  %s205_s4 = sand.u32 (!%p950_p7), 1, %s778_s16  }
  0x5b   : > { %s491_s10 = sshll.u32 (!%p950_p7), %s205_s4, 6  ;;  %s206_s15 = scalar_lea.sflag (!%p950_p7), [#allocation4], %s205_s4 }
  0x5c   : > { %s1040_s29 = scalar_lea.vmem (!%p950_p7), [#allocation3], %s491_s10  ;;  %p1141_p13 = scmp.ne.s32.totalorder (!%p950_p7), %s1134_s5, 0 }
  0x61   : > { %753 = dma.done.wait (%p1141_p13), %s206_s15, 1024  }
  0x62   : > { %755 = vsyncadd (%p1141_p13), %s206_s15, 4294966272  ;;  %s214_s26 = sand.u32 1, %s766_s13   ;;  %p1142_p3 = scmp.ne.s32.totalorder %s1138_s25, 0 }
  0x63   : > { %s215_s28 = scalar_lea.sflag [#allocation6], %s214_s26  ;;  %s217_s9 = scalar_lea.vmem [#allocation5], %s214_s26 }
  0x64   : > { %757 = dma.done.wait (%p1142_p3), %s215_s28, 16  }
  0x65   : > { %759 = vsyncadd (%p1142_p3), %s215_s28, 4294967280  ;;  %p245_p7 = scmp.lt.s32.totalorder %s786_s18, 12  ;;  %p249_p0 = scmp.lt.s32.totalorder %s790_s19, 2 }
  0x66   : > { %p492_p4 = scmp.ne.s32.totalorder %s786_s18, 0 }
  0x67   : > { %s1054_s8 = scalar_select %p245_p7, %s786_s18, 12 }
  0x68   : > { %s1162_s19 = smov (!%p249_p0, %s790_s19), 2  ;;  %256 = sbr.rel (%p492_p4) target bundleno = 111 (0x6f), region = 44 }
  0x69   : > { %s247_s24 = scalar_lea.vmem %s1120_s0, %s1054_s8  ;;  %s251_s25 = scalar_lea.vmem %s1123_s3, %s1162_s19  ;;  %v493_v0 = vld [vmem:[%s217_s9] ss:$0 sm:$0xff] (!%p492_p4) }
  0x6a   : > { %264 = vst [vmem:[#allocation2] sm:$0x3] (!%p492_p4), %v493_v0 }
  0x6f PF: > { %v640_v1 = vld [vmem:[%s1040_s29] sm:$0xff]   ;;  %v809_v2 = vmov 0.0   ;;  %v641_v3 = vld [vmem:[%s1040_s29 + $0x8] sm:$0xff]   ;;  %vm810_vm0 = vmmov 0   ;;  %v642_v4 = vld [vmem:[%s1040_s29 + $0x10] sm:$0xff]   ;;  %p502_p1 = scmp.ne.s32.totalorder %s786_s18, 12 }
  0x70   : > { %514 = vmatprep.subr.bf16.mxu0 %v809_v2  ;;  %530 = vmatprep.mubr.msk.bf16.mxu0 %vm810_vm0, %v809_v2  ;;  %v643_v5 = vld [vmem:[%s1040_s29 + $0x18] sm:$0xff]   ;;  %v644_v6 = vld [vmem:[%s1040_s29 + $0x20] sm:$0xff]   ;;  %v645_v7 = vld [vmem:[%s1040_s29 + $0x28] sm:$0xff]  }
  0x71   : > { %515 = vmatpush3.bf16.msra.mxu0 %v640_v1  ;;  %v646_v8 = vld [vmem:[%s1040_s29 + $0x30] sm:$0xff]   ;;  %v647_v9 = vld [vmem:[%s1040_s29 + $0x38] sm:$0xff]  }
  0x72   : > { %516 = vmatprep.subr.bf16.mxu0 %v809_v2  ;;  %v266_v10 = vld [vmem:[%s247_s24] sm:$0x1] }
  0x73   : > { %v265_v11 = vld [vmem:[#allocation2] sm:$0x3] }
  0x75   : > { %517 = vmatpush3.bf16.msra.mxu0 %v641_v3 }
  0x76   : > { %518 = vmatprep.subr.bf16.mxu0 %v809_v2 }
  0x79   : > { %519 = vmatpush3.bf16.msra.mxu0 %v642_v4 }
  0x7a   : > { %520 = vmatprep.subr.bf16.mxu0 %v809_v2 }
  0x7d   : > { %521 = vmatpush3.bf16.msra.mxu0 %v643_v5 }
  0x7e   : > { %522 = vmatprep.subr.bf16.mxu0 %v809_v2 }
  0x81   : > { %523 = vmatpush3.bf16.msra.mxu0 %v644_v6 }
  0x82   : > { %524 = vmatprep.subr.bf16.mxu0 %v809_v2 }
  0x85   : > { %525 = vmatpush3.bf16.msra.mxu0 %v645_v7 }
  0x86   : > { %526 = vmatprep.subr.bf16.mxu0 %v809_v2 }
  0x89   : > { %527 = vmatpush3.bf16.msra.mxu0 %v646_v8 }
  0x8a   : > { %528 = vmatprep.subr.bf16.mxu0 %v809_v2 }
  0x8d   : > { %529 = vmatpush3.bf16.msra.mxu0 %v647_v9 }
  0x90   : > { %531 = vmatmul.mubr.bf16.vlgmr.msra.gmra.mrb[0].mxu0 %v266_v10 }
 0x160   : > { %376 = sbr.rel (%p502_p1) target bundleno = 369 (0x171), region = 48 }
 0x163   : > { %v365_v12 = vpop.f32.mrb[0].mxu0 }
 0x164   : > { %v371_v13 = vadd.f32 %v365_v12, %v265_v11  ;;  %v532_v14 = vpop.f32.mrb[1].mxu0 }
 0x165   : > { %v368_v15 = vpop.f32.mrb[2].mxu0 }
 0x166   : > { %372 = vst [vmem:[#allocation2] sm:$0x3] %v371_v13  ;;  %v533_v16 = vpop.f32.mrb[3].mxu0 }
 0x16d   : > { %v377_v17 = vld [vmem:[#allocation2] sm:$0x3] }
 0x16e   : > { %v378_v18 = vpack.c.bf16 %v377_v17, %v377_v17 }
 0x170   : > { %379 = vst [vmem:[%s251_s25] sm:$0x1] %v378_v18 }
 0x171 PF: > { %s19_s22 = sadd.s32 1, %s802_s22   ;;  %s1143_s15 = smov %s989_s12 }
 0x172   : > { %p16_p11 = scmp.ge.s32.totalorder %s19_s22, 41   ;;  %s1144_s29 = sld [smem:[#allocation9_spill]] }
 0x173   : > { %s1145_s12 = smov %s766_s13  ;;  %s1146_s13 = smov %s770_s14 }
 0x174   : > { %s1147_s14 = smov %s1143_s15  ;;  %s1148_s15 = smov %s778_s16 }
 0x175   : > { %s1149_s16 = smov %s782_s17  ;;  %s1150_s17 = smov %s994_s30 }
 0x176   : > { %s1151_s18 = smov %s794_s20  ;;  %s1152_s19 = smov %s798_s21 }
 0x177   : > { %s1153_s20 = smov %s1156_s23  ;;  %18 = sbr.rel (!%p16_p11) target bundleno = 11 (0xb), region = 96 }
 0x178   : > { %s1154_s21 = smov %s1144_s29 }
 0x17e   :  { %397 = vsyncpa [#allocation4], 1 }
 0x17f   :  { %399 = vsyncpa [#allocation4 + $0x1], 1 }
 0x180   :  { %400 = vsyncpa [#allocation6], 1 }
 0x181   :  { %402 = vsyncpa [#allocation6 + $0x1], 1 }

// kernel: fastrcnn_forward.5
= control target key start
LH: loop header
LB: loop body
LE: loop exit
PB: predicated region body
PF: predicated region fallthrough
CT: control target
= control target key end

     0   :  { %10 = vsyncpa [#allocation4], 0  ;;  %s861_s15 = smov 0   ;;  %s961_s0 = inlined_call_operand.vmem [shape: bf16[2,384], index: 0, kind: input, shape index: {}]   ;;  %s962_s1 = inlined_call_operand.vmem [shape: bf16[384,256], index: 1, kind: input, shape index: {}]   ;;  %s963_s2 = inlined_call_operand.vmem [shape: f32[1,256], index: 2, kind: input, shape index: {}]   ;;  %s964_s3 = inlined_call_operand.vmem [shape: f32[2,32], index: 3, kind: output, shape index: {0}]   ;;  %s965_s4 = inlined_call_operand.hbm [shape: f32[2,128], index: 4, kind: output, shape index: {1}]  }
   0x1 LB: > { %s867_s16 = sadd.s32 4294967295, %s821_s15   ;;  %p689_p0 = scmp.ge.s32.totalorder %s821_s15, 1  ;;  %s821_s15 = sphi %s861_s15, %s16_s15  }
   0x2   : > { %p166_p1 = scmp.lt.s32.totalorder %s821_s15, 4 }
   0x4   : > { %p167_p2 = pnand %p689_p0, %p166_p1 }
   0x5   : > { %p191_p3 = scmp.lt.s32.totalorder (!%p167_p2), %s867_s16, 2  ;;  %s690_s17 = sshll.u32 (!%p167_p2), %s867_s16, 4 }
   0x6   : > { %170 = sbr.rel (%p167_p2) target bundleno = 891 (0x37b), region = 32  ;;  %p195_p4 = scmp.lt.s32.totalorder (!%p167_p2), %s690_s17, 47 }
   0x7   : > { %p693_p5 = scmp.ne.s32.totalorder (!%p167_p2), %s867_s16, 0 }
   0xd   : > { %s874_s18 = scalar_select %p191_p3, %s867_s16, 2 }
   0xe   : > { %s967_s17 = smov (!%p195_p4, %s690_s17), 47  ;;  %205 = sbr.rel (%p693_p5) target bundleno = 26 (0x1a), region = 36 }
   0xf   : > { %s193_s21 = scalar_lea.vmem %s961_s0, %s874_s18  ;;  %s717_s22 = sshll.u32 %s967_s17, 3  ;;  %v208_v0 = vlaneseq (!%p693_p5)  ;;  %v206_v2 = vld [vmem:[%s963_s2] sm:$0x3] (!%p693_p5) }
  0x10   : > { %s883_s25 = scalar_lea.vmem %s962_s1, %s717_s22 }
  0x11   : > { %v209_v1 = vshrl.u32 (!%p693_p5), %v208_v0, 7 }
  0x13   : > { %v210_v3 = vsub.s32 (!%p693_p5), 0, %v209_v1  ;;  %v214_v4 = vsub.s32 (!%p693_p5), 1, %v209_v1 }
  0x15   : > { %v211_v5 = vrot.slane %v206_v2, %v210_v3  ;;  %v215_v6 = vrot.slane %v206_v2, %v214_v4 }
  0x17   : > { %v216_v7 = vcombine.low %v211_v5, %v215_v6 }
  0x19   : > { %694 = vst.sshfl [vmem:[#allocation2] sm:$0x33 pattern:$0x76325410] %v216_v7 }
  0x1a PF: > { %v745_v8 = vld [vmem:[%s883_s25 + $0x4] ss:$8 sps:$4 sm:$0xff]   ;;  %v747_v9 = vld [vmem:[%s883_s25] ss:$8 sps:$4 sm:$0xff]   ;;  %v823_v10 = vmov 0   ;;  %v371_v28 = vlaneseq  ;;  %p711_p6 = scmp.ne.s32.totalorder %s867_s16, 2 }
  0x1b   : > { %356 = vmatprep.mubr.bf16.mxu0 %v823_v10  ;;  %324 = vmatprep.subr.bf16.mxu0 %v745_v8  ;;  %v748_v11 = vld [vmem:[%s883_s25 + $0x14] ss:$8 sps:$4 sm:$0xff]   ;;  %v750_v12 = vld [vmem:[%s883_s25 + $0x10] ss:$8 sps:$4 sm:$0xff]   ;;  %v751_v13 = vld [vmem:[%s883_s25 + $0x24] ss:$8 sps:$4 sm:$0xff]  }
  0x1c   : > { %325 = vmatpush1.bf16.msra.mxu0 %v747_v9  ;;  %v753_v14 = vld [vmem:[%s883_s25 + $0x20] ss:$8 sps:$4 sm:$0xff]   ;;  %v754_v15 = vld [vmem:[%s883_s25 + $0x34] ss:$8 sps:$4 sm:$0xff]   ;;  %v756_v16 = vld [vmem:[%s883_s25 + $0x30] ss:$8 sps:$4 sm:$0xff]  }
  0x1d   : > { %326 = vmatprep.subr.bf16.mxu0 %v748_v11  ;;  %v757_v17 = vld [vmem:[%s883_s25 + $0x44] ss:$8 sps:$4 sm:$0xff]   ;;  %v759_v18 = vld [vmem:[%s883_s25 + $0x40] ss:$8 sps:$4 sm:$0xff]   ;;  %v760_v19 = vld [vmem:[%s883_s25 + $0x54] ss:$8 sps:$4 sm:$0xff]  }
  0x1e   : > { %v762_v20 = vld [vmem:[%s883_s25 + $0x50] ss:$8 sps:$4 sm:$0xff]   ;;  %v763_v21 = vld [vmem:[%s883_s25 + $0x64] ss:$8 sps:$4 sm:$0xff]   ;;  %v765_v22 = vld [vmem:[%s883_s25 + $0x60] ss:$8 sps:$4 sm:$0xff]  }
  0x1f   : > { %v766_v23 = vld [vmem:[%s883_s25 + $0x74] ss:$8 sps:$4 sm:$0xff]   ;;  %v768_v24 = vld [vmem:[%s883_s25 + $0x70] ss:$8 sps:$4 sm:$0xff]   ;;  %v227_v25 = vld [vmem:[%s193_s21] sm:$0x1] }
  0x20   : > { %327 = vmatpush1.bf16.msra.mxu0 %v750_v12  ;;  %v824_v26 = vmov 1983009808   ;;  %v372_v30 = vshrl.u32 %v371_v28, 7  ;;  %v226_v36 = vld [vmem:[#allocation2] sm:$0xf]  ;;  %s825_s30 = smov (!%p711_p6), 120  }
  0x21   : > { %328 = vmatprep.subr.bf16.mxu0 %v751_v13  ;;  %v369_v27 = vunpack.c.l.s4 %v824_v26  ;;  %s826_s5 = smov (!%p711_p6), 104   ;;  %s827_s6 = smov (!%p711_p6), 112   ;;  %v828_v43 = vmov (!%p711_p6), 1934713408   ;;  %vm433_vm0 = vcmask (!%p711_p6), 60416   ;;  %v831_v4 = vmov (!%p711_p6), 0.0  }
  0x22   : > { %v395_v44 = vunpack.c.l.s4 (!%p711_p6), %v828_v43  ;;  %v829_v60 = vmov (!%p711_p6), 269488144   ;;  %v830_v62 = vmov (!%p711_p6), 842150450   ;;  %s832_s7 = smov (!%p711_p6), 16   ;;  %s833_s8 = smov (!%p711_p6), 8  }
  0x23   : > { %v370_v29 = vunpack.c.0.s8 %v369_v27  ;;  %v443_v61 = vunpack.c.l.s4 (!%p711_p6), %v829_v60  ;;  %v450_v63 = vunpack.c.l.s4 (!%p711_p6), %v830_v62  ;;  %s834_s9 = smov (!%p711_p6), 24   ;;  %vm607_vm1 = vcmask (!%p711_p6), 64512  }
  0x24   : > { %329 = vmatpush1.bf16.msra.mxu0 %v753_v14  ;;  %v396_v45 = vunpack.c.0.s8 (!%p711_p6), %v395_v44  ;;  %vm609_vm2 = vcmask (!%p711_p6), 130048   ;;  %vm611_vm3 = vcmask (!%p711_p6), 195584   ;;  %vm613_vm4 = vcmask (!%p711_p6), 254976  }
  0x25   : > { %330 = vmatprep.subr.bf16.mxu0 %v754_v15  ;;  %v910_v32 = vsub.s32 %v370_v29, %v372_v30  ;;  %v444_v0 = vunpack.c.0.s8 (!%p711_p6), %v443_v61  ;;  %v451_v1 = vunpack.c.0.s8 (!%p711_p6), %v450_v63 }
  0x26   : > { %v915_v48 = vsub.s32 (!%p711_p6), %v396_v45, %v372_v30 }
  0x27   : > { %v447_v2 = vsub.s32 (!%p711_p6), %v444_v0, %v372_v30  ;;  %v454_v3 = vsub.s32 (!%p711_p6), %v451_v1, %v372_v30 }
  0x28   : > { %331 = vmatpush1.bf16.msra.mxu0 %v756_v16 }
  0x29   : > { %332 = vmatprep.subr.bf16.mxu0 %v757_v17 }
  0x2c   : > { %333 = vmatpush1.bf16.msra.mxu0 %v759_v18 }
  0x2d   : > { %334 = vmatprep.subr.bf16.mxu0 %v760_v19 }
  0x30   : > { %335 = vmatpush1.bf16.msra.mxu0 %v762_v20 }
  0x31   : > { %336 = vmatprep.subr.bf16.mxu0 %v763_v21 }
  0x34   : > { %337 = vmatpush1.bf16.msra.mxu0 %v765_v22 }
  0x35   : > { %338 = vmatprep.subr.bf16.mxu0 %v766_v23 }
  0x38   : > { %339 = vmatpush1.bf16.msra.mxu0 %v768_v24 }
  0x3b   : > { %357 = vmatmul.mubr.bf16.vlgmr.msra.gmra.mrb[0].mxu0 %v227_v25 }
 0x10e   : > { %v358_v31 = vpop.f32.mrb[0].mxu0 }
 0x10f   : > { %v360_v33 = vpop.f32.mrb[1].mxu0 }
 0x110   : > { %v367_v34 = vcombine.low %v358_v31, %v360_v33  ;;  %v362_v35 = vpop.f32.mrb[2].mxu0  ;;  %381 = sbr.rel (%p711_p6) target bundleno = 866 (0x362), region = 40 }
 0x111   : > { %v363_v37 = vpop.f32.mrb[3].mxu0 }
 0x112   : > { %v374_v38 = vrot.slane %v367_v34, %v910_v32 }
 0x114   : > { %v376_v39 = vadd.f32 %v374_v38, %v226_v36 }
 0x116   : > { %377 = vst [vmem:[#allocation2] sm:$0xf] %v376_v39 }
 0x11d   : > { %v382_v40 = vld [vmem:[#allocation2] sm:$0xf] }
 0x11e   : > { %384 = vrot.lane.b32.xlu0 %v382_v40, %s825_s30  ;;  %v621_v41 = vrot.slane %v382_v40, %v910_v32  ;;  %390 = vrot.lane.b32.xlu1 %v382_v40, %s826_s5 }
 0x120   : > { %v622_v42 = vcombine.high %v621_v41, %v621_v41 }
 0x122   : > { %624 = vst [vmem:[#allocation3] sm:$0x3] %v622_v42  ;;  %387 = vrot.lane.b32.xlu0 %v382_v40, %s827_s6 }
 0x190   : > { %v385_v46 = vpop.permute.xlu0 %384  ;;  %v391_v47 = vpop.permute.xlu1 %390 }
 0x191   : > { %v393_v49 = vcombine.low %v382_v40, %v385_v46 }
 0x193   : > { %v400_v52 = vrot.slane %v393_v49, %v915_v48 }
 0x194   : > { %v388_v50 = vpop.permute.xlu0 %387 }
 0x195   : > { %v402_v51 = vcombine.low %v388_v50, %v391_v47  ;;  %v401_v5 = vcombine.high %v400_v52, %v831_v4 }
 0x197   : > { %v409_v53 = vrot.slane %v402_v51, %v915_v48 }
 0x199   : > { %v712_v54 = vcombine.high %v400_v52, %v409_v53  ;;  %v415_v55 = vcombine.low %v400_v52, %v409_v53  ;;  %v410_v7 = vcombine.high %v409_v53, %v831_v4 }
 0x19b   : > { %v430_v56 = vrot.slane %v712_v54, %v910_v32  ;;  %v422_v57 = vrot.slane %v415_v55, %v910_v32 }
 0x19d   : > { %v437_v58 = vsel %vm433_vm0, %v430_v56, -inf  ;;  %v434_v59 = vsel %vm433_vm0, %v422_v57, -inf }
 0x19e   : > { %438 = vmax.xlane.f32.xlu0 %v437_v58  ;;  %435 = vmax.xlane.f32.xlu1 %v434_v59 }
 0x22b   : > { %v439_v6 = vpop.xlane.xlu0 %438  ;;  %v436_v8 = vpop.xlane.xlu1 %435 }
 0x22c   : > { %v462_v9 = vrot.slane %v439_v6, %v447_v2  ;;  %v469_v10 = vrot.slane %v439_v6, %v454_v3  ;;  %v448_v11 = vrot.slane %v436_v8, %v447_v2  ;;  %v455_v12 = vrot.slane %v436_v8, %v454_v3 }
 0x22e   : > { %v476_v13 = vsub.f32 %v401_v5, %v462_v9  ;;  %v477_v14 = vsub.f32 %v410_v7, %v469_v10  ;;  %v474_v15 = vsub.f32 %v400_v52, %v448_v11  ;;  %v475_v16 = vsub.f32 %v409_v53, %v455_v12 }
 0x230   : > { %v482_v17 = vmul.f32 1.442695, %v476_v13  ;;  %v484_v18 = vmul.f32 1.442695, %v477_v14  ;;  %v478_v19 = vmul.f32 1.442695, %v474_v15 }
 0x231   : > { %v480_v20 = vmul.f32 1.442695, %v475_v16 }
 0x232   : > { %769 = vpow2.f32 %v482_v17 }
 0x233   : > { %771 = vpow2.f32 %v484_v18 }
 0x234   : > { %773 = vpow2.f32 %v478_v19 }
 0x235   : > { %775 = vpow2.f32 %v480_v20 }
 0x23c   : > { %v770_v21 = vpop.eup %769 }
 0x23d   : > { %v772_v22 = vpop.eup %771 }
 0x23e   : > { %v774_v23 = vpop.eup %773  ;;  %v498_v24 = vcombine.low %v770_v21, %v772_v22 }
 0x23f   : > { %v776_v25 = vpop.eup %775 }
 0x240   : > { %v490_v26 = vcombine.low %v774_v23, %v776_v25  ;;  %v505_v27 = vrot.slane %v498_v24, %v910_v32 }
 0x242   : > { %v497_v28 = vrot.slane %v490_v26, %v910_v32  ;;  %v511_v29 = vsel %vm433_vm0, %v505_v27, 0.0 }
 0x243   : > { %512 = vadd.xlane.f32.xlu1 %v511_v29 }
 0x244   : > { %v508_v30 = vsel %vm433_vm0, %v497_v28, 0.0 }
 0x245   : > { %509 = vadd.xlane.f32.xlu0 %v508_v30 }
 0x2d0   : > { %v513_v31 = vpop.xlane.xlu1 %512 }
 0x2d1   : > { %v536_v33 = vrot.slane %v513_v31, %v447_v2  ;;  %v543_v34 = vrot.slane %v513_v31, %v454_v3 }
 0x2d2   : > { %v510_v35 = vpop.xlane.xlu0 %509 }
 0x2d3   : > { %v522_v36 = vrot.slane %v510_v35, %v447_v2  ;;  %v529_v37 = vrot.slane %v510_v35, %v454_v3  ;;  %777 = vrcp.f32 %v536_v33 }
 0x2d4   : > { %779 = vrcp.f32 %v543_v34 }
 0x2d5   : > { %781 = vrcp.f32 %v522_v36 }
 0x2d6   : > { %783 = vrcp.f32 %v529_v37 }
 0x2dd   : > { %v778_v38 = vpop.eup %777 }
 0x2de   : > { %v780_v39 = vpop.eup %779  ;;  %v553_v40 = vmul.f32 %v778_v38, %v770_v21 }
 0x2df   : > { %v782_v41 = vpop.eup %781  ;;  %v555_v42 = vmul.f32 %v780_v39, %v772_v22 }
 0x2e0   : > { %v784_v43 = vpop.eup %783  ;;  %v549_v44 = vmul.f32 %v782_v41, %v774_v23 }
 0x2e1   : > { %v551_v45 = vmul.f32 %v784_v43, %v776_v25 }
 0x2e2   : > { %v556_v46 = vcombine.low %v549_v44, %v553_v40 }
 0x2e3   : > { %v565_v47 = vcombine.low %v551_v45, %v555_v42 }
 0x2e4   : > { %v563_v49 = vrot.slane %v556_v46, %v915_v48 }
 0x2e5   : > { %v572_v50 = vrot.slane %v565_v47, %v915_v48 }
 0x2e6   : > { %v564_v51 = vcombine.high %v563_v49, %v831_v4 }
 0x2e7   : > { %v592_v52 = vrot.slane %v572_v50, %v910_v32  ;;  %v573_v53 = vcombine.high %v572_v50, %v831_v4 }
 0x2e8   : > { %v581_v54 = vrot.slane %v564_v51, %v910_v32 }
 0x2e9   : > { %593 = vrot.lane.b32.xlu1 %v592_v52, %s832_s7  ;;  %v603_v55 = vrot.slane %v573_v53, %v910_v32 }
 0x2ea   : > { %582 = vrot.lane.b32.xlu0 %v581_v54, %s833_s8 }
 0x2ed   : > { %604 = vrot.lane.b32.xlu1 %v603_v55, %s834_s9 }
 0x35b   : > { %v594_v56 = vpop.permute.xlu1 %593 }
 0x35c   : > { %v583_v57 = vpop.permute.xlu0 %582 }
 0x35d   : > { %v608_v58 = vsel %vm607_vm1, %v563_v49, %v583_v57 }
 0x35e   : > { %v610_v48 = vsel %vm609_vm2, %v608_v58, %v594_v56 }
 0x35f   : > { %v605_v59 = vpop.permute.xlu1 %604 }
 0x360   : > { %v612_v60 = vsel %vm611_vm3, %v610_v48, %v605_v59 }
 0x361   : > { %614 = vst.msk [vmem:[%s964_s3] sm:$0x3] %vm613_vm4, %v612_v60 }
 0x362 PF: > { %p722_p7 = scmp.eq.s32.totalorder %s867_s16, 2  ;;  %s835_s12 = smov [#allocation3]  }
 0x363   : > { %s635_s13 = sshll.u32 %s835_s12, 4  ;;  %s636_s13 = int_to_ptr.vmem [resolvable:$true] %s635_s13 }
 0x364   : > { %s785_s14 = scalar_lea.vmem %s636_s13, 32  ;;  %p792_p11 = scmp.lt.s32.totalorder %s636_s13, %s636_s13 }
 0x365   : > { %p786_p8 = scmp.ne.s32.totalorder %s636_s13, %s785_s14  ;;  %p793_p12 = scmp.lt.s32.totalorder %s785_s14, %s785_s14 }
 0x367   : > { %p787_p9 = pnand %p786_p8, %p722_p7  ;;  %p794_p13 = por %p793_p12, %p792_p11 }
 0x369   : > { %p788_p10 = pneg %p787_p9 }
 0x36b   : > { %p795_p0 = pnand %p794_p13, %p788_p10 }
 0x36d   : > { %798 = shalt.err (!%p795_p0)
}
 0x36e   : > { %s799_s19 = scalar_lea.hbm %s965_s4, 32 }
 0x36f   : > { %p800_p1 = scmp.ne.s32.totalorder %s965_s4, %s799_s19  ;;  %p805_p4 = scmp.lt.u32.totalorder %s799_s19, %s965_s4 }
 0x371   : > { %p801_p2 = pnand %p800_p1, %p722_p7 }
 0x373   : > { %p802_p3 = pneg %p801_p2 }
 0x375   : > { %p807_p5 = pnand %p805_p4, %p802_p3 }
 0x377   : > { %810 = shalt.err (!%p807_p5)
}
 0x378   : > { %719 = dma.vmem_to_hbm [thread:$0]  (%p722_p7), %s636_s13, 32, %s965_s4, [#allocation4]  }
 0x379   : > { %816 = dma.done.wait (%p722_p7), [#allocation4], 32  }
 0x37a   : > { %818 = vsyncadd (%p722_p7), [#allocation4], 4294967264 }
 0x37b PF: > { %s16_s15 = sadd.s32 1, %s821_s15  }
 0x37c   : > { %p13_p6 = scmp.ge.s32.totalorder %s16_s15, 5  }
 0x37e   :  { %15 = sbr.rel (!%p13_p6) target bundleno = 1 (0x1), region = 78 }
 0x385   :  { %651 = vsyncpa [#allocation4], 1 }
 0x386   :  { %653 = vsyncpa [#allocation4 + $0x1], 1 }

</bundles_post_ra>
